<compile_context>
chip_gen: v5e
topology: v5e:2x2
jax: 0.10.0
libtpu: 0.0.40
codegen_flags: <defaults>
</compile_context>

<pallas_src>
import functools

import jax
import jax.numpy as jnp
from jax.experimental import pallas as pl
from jax.experimental.pallas import tpu as pltpu


# ---------------------------------------------------------------------------
# "args" of the PyTorch module, fixed deterministically in-script.
# ---------------------------------------------------------------------------
ARGS = {
    "bl_method_1": "soft_light",
    "bl_method_2": "multiply",
    "bl_method_1_op": 0.7,
    "bl_method_2_op": 0.8,
    "bl_final_weight_min": 0.4,
    "bl_final_weight_max": 0.6,
}

# Blend modes whose output stays in [0, 1] when A, B are in [0, 1] (images),
# so the clip in get_blending_result is a statically-provable no-op.
# soft_light is bounded too:  A<=0.5: B^2 <= C <= B ;  A>0.5: B <= C <= sqrt(B).
_UNIT_BOUNDED = frozenset({"multiply", "darken", "lighten", "hard_light", "soft_light"})


def _blend_mode(method, A, B):
    """Static selection of the blend formula (A = foreground, B = background)."""
    if method == "soft_light":
        return jnp.where(
            A <= 0.5,
            (2.0 * A - 1.0) * (B - B * B) + B,
            (2.0 * A - 1.0) * (jnp.sqrt(B) - B) + B,
        )
    elif method == "hard_light":
        return jnp.where(A <= 0.5, 2.0 * A * B, 1.0 - 2.0 * (1.0 - A) * (1.0 - B))
    elif method == "lighten":
        return jnp.maximum(A, B)
    elif method == "darken":
        return jnp.minimum(A, B)
    elif method == "multiply":
        return A * B
    elif method == "grain_merge":
        return A + B - 0.5
    else:
        raise ValueError(f"unknown blend method {method}")


def _blending_kernel(method_1, method_2, assume_finite,
                     coef_ref, fg_ref, bg_ref, out_ref):
    """Fused elementwise blending kernel.

    coef_ref        : (3,) f32 SMEM scalar-prefetch [c1, c2, c3].
    fg_ref / bg_ref : (block_rows, lane) VMEM tiles in the input dtype.
    out_ref         : (block_rows, lane) VMEM tile in the input dtype.
    """
    A = fg_ref[...].astype(jnp.float32)
    B = bg_ref[...].astype(jnp.float32)

    c1 = coef_ref[0]
    c2 = coef_ref[1]
    c3 = coef_ref[2]

    # --- blend 2 contribution -------------------------------------------
    comp2 = _blend_mode(method_2, A, B)
    if method_2 not in _UNIT_BOUNDED:
        comp2 = jnp.clip(comp2, 0.0, 1.0)

    # --- blend 1 contribution + fused mix --------------------------------
    if method_1 == "soft_light":
        # comp1 = B + t*sel  with t = 2A-1, sel = (A<=0.5 ? B-B^2 : sqrt(B)-B).
        # Fold c1*comp1 + c3*B  ==  c1*(t*sel) + (c1+c3)*B   (scalar add free).
        t = 2.0 * A - 1.0
        sel = jnp.where(A <= 0.5, B - B * B, jnp.sqrt(B) - B)
        out = c1 * (t * sel) + c2 * comp2 + (c1 + c3) * B
    else:
        comp1 = _blend_mode(method_1, A, B)
        if method_1 not in _UNIT_BOUNDED:
            comp1 = jnp.clip(comp1, 0.0, 1.0)
        out = c1 * comp1 + c2 * comp2 + c3 * B

    if not assume_finite:
        # torch.nan_to_num on the final output (only reachable for
        # non-finite inputs; dead for image-range data).
        out = jnp.where(jnp.isnan(out), 0.0, out)

    out_ref[...] = out.astype(out_ref.dtype)


def blending_forward(img_background, img_foreground, weight, args=ARGS,
                     target_block_bytes=4 << 20, assume_finite_inputs=True):
    """JAX/Pallas equivalent of Blending.forward.

    img_background, img_foreground : (B, 3, H, W) float (NCHW, like PyTorch).
    weight                         : () or (1,) float, the random final weight
                                     (drawn outside to keep the kernel pure).
    Returns (result (B,3,H,W) in the input dtype, weight (1,) f32).
    """
    assert img_background.shape == img_foreground.shape
    b, c, h, w = img_background.shape
    assert c == 3
    dtype = img_background.dtype
    itemsize = jnp.dtype(dtype).itemsize

    # ---- zero-copy 2-D lane-dense view (no pad, no cast, no copy) --------
    lane, rows = w, b * c * h
    # Fold whole rows into the lane dim (still an exact, free reshape) until
    # the lane width is a multiple of 128 -> unmasked full-width stores.
    while lane % 128 != 0 and lane < 1024 and rows % 2 == 0:
        lane *= 2
        rows //= 2
    bg2d = img_background.reshape(rows, lane)
    fg2d = img_foreground.reshape(rows, lane)

    # ---- adaptive block: ~target_block_bytes per operand ------------------
    if rows <= 8:
        br = rows                                   # block dim == full dim
    else:
        br = max(8, target_block_bytes // (lane * itemsize))
        br = min(br, rows)
        br = (br // 8) * 8                          # multiple of 8
    n_grid = pl.cdiv(rows, br)                      # ragged last block OK

    # ---- scalar coefficients of the fused mix -----------------------------
    # Alpha channels are identically 1, so ratio_i == opacity_i and the
    # NaN/Inf guard in _compose_alpha is dead.
    w_arr = jnp.asarray(weight, jnp.float32).reshape(())
    op1 = jnp.float32(args["bl_method_1_op"])
    op2 = jnp.float32(args["bl_method_2_op"])
    c1 = w_arr * op1
    c2 = (1.0 - w_arr) * op2
    c3 = 1.0 - c1 - c2
    coefs = jnp.stack([c1, c2, c3]).astype(jnp.float32)

    kernel = functools.partial(
        _blending_kernel, args["bl_method_1"], args["bl_method_2"],
        assume_finite_inputs,
    )

    n_elems = rows * lane
    cost = pl.CostEstimate(
        flops=16 * n_elems,                 # ~16 VALU ops / element
        transcendentals=n_elems,            # one sqrt / element (soft_light)
        bytes_accessed=3 * n_elems * itemsize,
    )

    out2d = pl.pallas_call(
        kernel,
        out_shape=jax.ShapeDtypeStruct((rows, lane), dtype),
        grid_spec=pltpu.PrefetchScalarGridSpec(
            num_scalar_prefetch=1,                               # coefs -> SMEM
            grid=(n_grid,),
            in_specs=[
                pl.BlockSpec((br, lane), lambda i, coef: (i, 0)),  # foreground
                pl.BlockSpec((br, lane), lambda i, coef: (i, 0)),  # background
            ],
            out_specs=pl.BlockSpec((br, lane), lambda i, coef: (i, 0)),
        ),
        compiler_params=pltpu.CompilerParams(
            dimension_semantics=("parallel",),
            vmem_limit_bytes=32 << 20,      # 24 MiB double-buffered worst case
        ),
        cost_estimate=cost,
    )(coefs, fg2d, bg2d)

    result = out2d.reshape(b, c, h, w)
    return result, w_arr.reshape((1,))


# ---------------------------------------------------------------------------
# Pure-JAX reference (mirrors the PyTorch module) for a correctness check.
# ---------------------------------------------------------------------------
def _reference(img_background, img_foreground, weight, args=ARGS):
    A = img_foreground.astype(jnp.float32)
    B = img_background.astype(jnp.float32)

    def one(method, op):
        ratio = op / (op + (1.0 - op) * 1.0)     # alpha channels == 1
        comp = jnp.clip(_blend_mode(method, A, B), 0.0, 1.0)
        return jnp.nan_to_num(comp * ratio + B * (1.0 - ratio))

    r1 = one(args["bl_method_1"], args["bl_method_1_op"])
    r2 = one(args["bl_method_2"], args["bl_method_2_op"])
    w = jnp.asarray(weight, jnp.float32).reshape(())
    return r1 * w + r2 * (1.0 - w)


if __name__ == "__main__":
    key = jax.random.PRNGKey(0)
    k_bg, k_fg, k_w, k_bg2, k_fg2 = jax.random.split(key, 5)

    # random.uniform(*final_weight_range) — drawn deterministically here.
    # TODO(synk): host-side random.uniform has no in-kernel equivalent; weight
    # is sampled with jax.random outside the kernel.
    weight = jax.random.uniform(
        k_w, (1,), dtype=jnp.float32,
        minval=ARGS["bl_final_weight_min"], maxval=ARGS["bl_final_weight_max"],
    )

    # Case 1: small NCHW image, exercises the lane-widening (16 -> 128) path.
    B1, C1, H1, W1 = 2, 3, 16, 16
    bg1 = jax.random.uniform(k_bg, (B1, C1, H1, W1), dtype=jnp.float32)
    fg1 = jax.random.uniform(k_fg, (B1, C1, H1, W1), dtype=jnp.float32)
    res1, w_out = blending_forward(bg1, fg1, weight)
    res1 = jax.block_until_ready(res1)
    assert res1.shape == (B1, C1, H1, W1)
    assert jnp.allclose(res1, _reference(bg1, fg1, weight), atol=1e-5, rtol=1e-5), \
        "mismatch vs reference (case 1)"

    # Case 2: non-aligned spatial dims, exercises the ragged last row-block.
    B2, C2, H2, W2 = 1, 3, 37, 100
    bg2 = jax.random.uniform(k_bg2, (B2, C2, H2, W2), dtype=jnp.float32)
    fg2 = jax.random.uniform(k_fg2, (B2, C2, H2, W2), dtype=jnp.float32)
    res2, _ = blending_forward(bg2, fg2, weight)
    res2 = jax.block_until_ready(res2)
    assert res2.shape == (B2, C2, H2, W2)
    assert jnp.allclose(res2, _reference(bg2, fg2, weight), atol=1e-5, rtol=1e-5), \
        "mismatch vs reference (case 2)"

    print("KERNEL_OK")
</pallas_src>

<mosaic_0001>
module attributes {stable_mosaic.version = 11 : i64} {
  func.func @_blending_kernel(%arg0: i32, %arg1: memref<3xf32, #tpu.memory_space<smem>>, %arg2: memref<8x128xf32, #tpu.memory_space<vmem>>, %arg3: memref<8x128xf32, #tpu.memory_space<vmem>>, %arg4: memref<8x128xf32, #tpu.memory_space<vmem>>) attributes {dimension_semantics = [#tpu.dimension_semantics<parallel>], iteration_bounds = array<i64: 2>, scalar_prefetch = 1 : i64, scratch_operands = 0 : i64, tpu.core_type = #tpu.core_type<tc>, window_params = [{transform_indices = @transform_0, window_bounds = array<i64: 8, 128>}, {transform_indices = @transform_1, window_bounds = array<i64: 8, 128>}, {transform_indices = @transform_2, window_bounds = array<i64: 8, 128>}]} {
    %c0 = arith.constant 0 : index
    %c0_0 = arith.constant 0 : index
    %0 = vector.load %arg2[%c0, %c0_0] : memref<8x128xf32, #tpu.memory_space<vmem>>, vector<8x128xf32>
    %c0_1 = arith.constant 0 : index
    %c0_2 = arith.constant 0 : index
    %1 = vector.load %arg3[%c0_1, %c0_2] : memref<8x128xf32, #tpu.memory_space<vmem>>, vector<8x128xf32>
    %c0_3 = arith.constant 0 : index
    %2 = memref.load %arg1[%c0_3] : memref<3xf32, #tpu.memory_space<smem>>
    %c1 = arith.constant 1 : index
    %3 = memref.load %arg1[%c1] : memref<3xf32, #tpu.memory_space<smem>>
    %c2 = arith.constant 2 : index
    %4 = memref.load %arg1[%c2] : memref<3xf32, #tpu.memory_space<smem>>
    %5 = arith.mulf %0, %1 : vector<8x128xf32>
    %cst = arith.constant 2.000000e+00 : f32
    %6 = vector.broadcast %cst : f32 to vector<8x128xf32>
    %7 = arith.mulf %6, %0 : vector<8x128xf32>
    %cst_4 = arith.constant 1.000000e+00 : f32
    %8 = vector.broadcast %cst_4 : f32 to vector<8x128xf32>
    %9 = arith.subf %7, %8 : vector<8x128xf32>
    %cst_5 = arith.constant 5.000000e-01 : f32
    %10 = vector.broadcast %cst_5 : f32 to vector<8x128xf32>
    %11 = arith.cmpf ole, %0, %10 : vector<8x128xf32>
    %12 = arith.mulf %1, %1 : vector<8x128xf32>
    %13 = arith.subf %1, %12 : vector<8x128xf32>
    %14 = math.sqrt %1 : vector<8x128xf32>
    %15 = arith.subf %14, %1 : vector<8x128xf32>
    %16 = arith.select %11, %13, %15 : vector<8x128xi1>, vector<8x128xf32>
    %17 = arith.mulf %9, %16 : vector<8x128xf32>
    %18 = vector.broadcast %2 : f32 to vector<8x128xf32>
    %19 = arith.mulf %18, %17 : vector<8x128xf32>
    %20 = vector.broadcast %3 : f32 to vector<8x128xf32>
    %21 = arith.mulf %20, %5 : vector<8x128xf32>
    %22 = arith.addf %19, %21 : vector<8x128xf32>
    %23 = arith.addf %2, %4 : f32
    %24 = vector.broadcast %23 : f32 to vector<8x128xf32>
    %25 = arith.mulf %24, %1 : vector<8x128xf32>
    %26 = arith.addf %22, %25 : vector<8x128xf32>
    %c0_6 = arith.constant 0 : index
    %c0_7 = arith.constant 0 : index
    %27 = vector.load %arg4[%c0_6, %c0_7] : memref<8x128xf32, #tpu.memory_space<vmem>>, vector<8x128xf32>
    tpu.vector_store %arg4[%c0_6, %c0_7], %26 {strides = array<i32>} : memref<8x128xf32, #tpu.memory_space<vmem>>, vector<8x128xf32>,
    return
  }
  func.func @transform_0(%arg0: i32, %arg1: memref<3xf32, #tpu.memory_space<smem>>) -> (i32, i32) {
    %c0_i32 = arith.constant 0 : i32
    %c0_i32_0 = arith.constant 0 : i32
    return %arg0, %c0_i32 : i32, i32
  }
  func.func @transform_1(%arg0: i32, %arg1: memref<3xf32, #tpu.memory_space<smem>>) -> (i32, i32) {
    %c0_i32 = arith.constant 0 : i32
    %c0_i32_0 = arith.constant 0 : i32
    return %arg0, %c0_i32 : i32, i32
  }
  func.func @transform_2(%arg0: i32, %arg1: memref<3xf32, #tpu.memory_space<smem>>) -> (i32, i32) {
    %c0_i32 = arith.constant 0 : i32
    %c0_i32_0 = arith.constant 0 : i32
    return %arg0, %c0_i32 : i32, i32
  }
}

</mosaic_0001>

<bundles_post_ra>
// kernel: tpu_custom_call.1
= control target key start
LH: loop header
LB: loop body
LE: loop exit
PB: predicated region body
PF: predicated region fallthrough
CT: control target
= control target key end

     0   :  { %s572_s15 = smov [#allocation3]   ;;  %s765_s0 = inlined_call_operand.hbm [shape: f32[3], index: 0, kind: input, shape index: {}]   ;;  %s766_s1 = inlined_call_operand.hbm [shape: f32[12,128], index: 1, kind: input, shape index: {}]   ;;  %s767_s2 = inlined_call_operand.hbm [shape: f32[12,128], index: 2, kind: input, shape index: {}]   ;;  %s768_s3 = inlined_call_operand.hbm [shape: f32[12,128], index: 3, kind: output, shape index: {}]  }
   0x1   :  { %s9_s14 = sshll.u32 %s765_s0, 4  ;;  %s10_s14 = int_to_ptr.hbm [resolvable:$true] %s9_s14 }
   0x2   :  { %12 = dma.hbm_to_smem %s10_s14, 16, %s572_s15, [#allocation2] }
   0x3   :  { %542 = dma.done.wait [#allocation2], 16 }
   0x4   :  { %543 = vsyncadd [#allocation2], 4294967280 }
   0x5   :  { %15 = sfence }
   0x6   :  { %16 = vsyncpa [#allocation5], 0 }
   0x7   :  { %18 = vsyncpa [#allocation5 + $0x1], 0 }
   0x8   :  { %19 = vsyncpa [#allocation8], 0 }
   0x9   :  { %21 = vsyncpa [#allocation8 + $0x1], 0 }
   0xa   :  { %22 = vsyncpa [#allocation6], 0 }
   0xb   :  { %24 = vsyncpa [#allocation6 + $0x1], 0  ;;  %s596_s16 = smov 0   ;;  %s598_s17 = smov 0  }
   0xc   :  { %s600_s18 = smov 0   ;;  %s602_s19 = smov 0  }
   0xd LB: > { %s617_s0 = sadd.s32 4294967295, %s570_s19   ;;  %s354_s20 = sadd.s32 4294967294, %s570_s19   ;;  %s570_s19 = sphi %s602_s19, %s779_s19   ;;  %s566_s18 = sphi %s600_s18, %s778_s18   ;;  %s562_s17 = sphi %s598_s17, %s777_s17   ;;  %s558_s16 = sphi %s596_s16, %s776_s16  }
   0xe   : > { %s621_s21 = sadd.s32 1, %s570_s19   ;;  %s37_s22 = sadd.s32 1, %s566_s18 }
   0xf   : > { %s34_s23 = ssub.s32 %s570_s19, %s621_s21  ;;  %p44_p0 = scmp.ne.s32.totalorder %s566_s18, %s562_s17 }
  0x10   : > { %p35_p1 = scmp.eq.s32.totalorder %s34_s23, 0  ;;  %p45_p2 = scmp.eq.s32.totalorder %s570_s19, 0 }
  0x11   : > { %p50_p3 = scmp.ne.s32.totalorder %s562_s17, %s558_s16  ;;  %p51_p4 = scmp.eq.s32.totalorder %s617_s0, 0 }
  0x12   : > { %s633_s24 = scalar_select %p35_p1, %s566_s18, %s37_s22  }
  0x13   : > { %p635_p5 = por %p45_p2, %p44_p0  ;;  %p639_p6 = por %p51_p4, %p50_p3 }
  0x14   : > { %p100_p7 = scmp.eq.s32.totalorder %s617_s0, 1  ;;  %p106_p8 = scmp.eq.s32.totalorder %s354_s20, 1 }
  0x15   : > { %p389_p10 = scmp.lt.s32.totalorder %s570_s19, 2  ;;  %s655_s29 = sand.u32 1, %s566_s18  }
  0x16   : > { %p646_p11 = por %p100_p7, %p44_p0  ;;  %p650_p12 = por %p106_p8, %p50_p3 }
  0x17   : > { %s358_s30 = sshll.u32 %s570_s19, 3  ;;  %s357_s4 = sshll.u32 %s655_s29, 3 }
  0x18   : > { %s134_s7 = scalar_lea.hbm %s766_s1, %s358_s30  ;;  %s130_s9 = scalar_lea.vmem [#allocation4], %s357_s4 }
  0x19   : > { %s136_s8 = sshll.u32 %s134_s7, 4  ;;  %s138_s10 = sshll.u32 %s130_s9, 4  ;;  %s137_s8 = int_to_ptr.hbm [resolvable:$true] %s136_s8  ;;  %s139_s10 = int_to_ptr.vmem [resolvable:$true] %s138_s10 }
  0x1a   : > { %p664_p13 = pnand %p389_p10, %p635_p5  ;;  %p361_p0 = scmp.ge.s32.totalorder %s570_s19, 1 }
  0x1b   : > { %p162_p1 = scmp.lt.s32.totalorder %s570_s19, 3  ;;  %s127_s12 = scalar_lea.sflag [#allocation5], %s655_s29 }
  0x1c   : > { %s438_s13 = sshra.s32 %s137_s8, 4  ;;  %p442_p3 = pneg %p664_p13  ;;  %s439_s13 = int_to_ptr.hbm [resolvable:$true] %s438_s13 }
  0x1d   : > { %s440_s14 = scalar_lea.hbm %s439_s13, 8  ;;  %s445_s22 = scalar_lea.hbm %s766_s1, 16 }
  0x1e   : > { %p441_p2 = scmp.ne.s32.totalorder %s439_s13, %s440_s14  ;;  %p446_p5 = scmp.lt.s32.totalorder %s439_s13, %s766_s1 }
  0x1f   : > { %p447_p8 = scmp.lt.s32.totalorder %s445_s22, %s440_s14 }
  0x20   : > { %p443_p4 = pnand %p442_p3, %p441_p2 }
  0x21   : > { %p448_p10 = por %p447_p8, %p446_p5 }
  0x22   : > { %p444_p7 = pneg %p443_p4 }
  0x24   : > { %p449_p9 = pnand %p448_p10, %p444_p7 }
  0x26   : > { %452 = shalt.err (!%p449_p9)
}
  0x27   : > { %381 = dma.hbm_to_vmem [thread:$0]  (!%p664_p13), %s137_s8, 128, %s139_s10, %s127_s12  }
  0x28   : > { %p688_p2 = pnand %p361_p0, %p162_p1  ;;  %s153_s9 = scalar_lea.hbm %s767_s2, %s358_s30 }
  0x29   : > { %s155_s13 = sshll.u32 %s153_s9, 4  ;;  %s149_s14 = scalar_lea.vmem [#allocation7], %s357_s4  ;;  %s156_s13 = int_to_ptr.hbm [resolvable:$true] %s155_s13 }
  0x2a   : > { %s157_s15 = sshll.u32 %s149_s14, 4  ;;  %s146_s20 = scalar_lea.sflag [#allocation8], %s655_s29  ;;  %s158_s15 = int_to_ptr.vmem [resolvable:$true] %s157_s15 }
  0x2b   : > { %s468_s22 = sshra.s32 %s156_s13, 4  ;;  %s475_s12 = scalar_lea.hbm %s767_s2, 16  ;;  %s469_s22 = int_to_ptr.hbm [resolvable:$true] %s468_s22 }
  0x2c   : > { %s470_s23 = scalar_lea.hbm %s469_s22, 8  ;;  %p476_p4 = scmp.lt.s32.totalorder %s469_s22, %s767_s2 }
  0x2d   : > { %p471_p9 = scmp.ne.s32.totalorder %s469_s22, %s470_s23  ;;  %p477_p7 = scmp.lt.s32.totalorder %s475_s12, %s470_s23 }
  0x2f   : > { %p473_p0 = pnand %p471_p9, %p442_p3  ;;  %p478_p5 = por %p477_p7, %p476_p4 }
  0x31   : > { %p474_p1 = pneg %p473_p0 }
  0x33   : > { %p479_p8 = pnand %p478_p5, %p474_p1 }
  0x35   : > { %482 = shalt.err (!%p479_p8)
}
  0x36   : > { %384 = dma.hbm_to_vmem [thread:$0]  (!%p664_p13), %s156_s13, 128, %s158_s15, %s146_s20  }
  0x37   : > { %166 = sbr.rel (%p688_p2) target bundleno = 99 (0x63), region = 28  ;;  %s710_s29 = sand.u32 (!%p688_p2), 1, %s562_s17  }
  0x38   : > { %s713_s4 = sshll.u32 (!%p688_p2), %s710_s29, 3  ;;  %s169_s6 = scalar_lea.sflag (!%p688_p2), [#allocation5], %s710_s29 }
  0x39   : > { %s172_s7 = scalar_lea.vmem (!%p688_p2), [#allocation4], %s713_s4 }
  0x3c   : > { %545 = dma.done.wait (%p639_p6), %s169_s6, 128  }
  0x3d   : > { %547 = vsyncadd (%p639_p6), %s169_s6, 4294967168  ;;  %s179_s11 = scalar_lea.sflag [#allocation8], %s710_s29  ;;  %s182_s5 = scalar_lea.vmem [#allocation7], %s713_s4 }
  0x3e   : > { %549 = dma.done.wait (%p639_p6), %s179_s11, 128  }
  0x3f   : > { %551 = vsyncadd (%p639_p6), %s179_s11, 4294967168  ;;  %v210_v0 = vld [vmem:[%s182_s5] sm:$0xff]  ;;  %s727_s9 = sld [smem:[#allocation3]]  ;;  %v209_v5 = vld [vmem:[%s172_s7] sm:$0xff]  ;;  %s369_s15 = sshll.u32 %s617_s0, 3 }
  0x40   : > { %424 = vrsqrt.f32 %v210_v0  ;;  %s366_s13 = sld [smem:[#allocation3 + $0x2]]  ;;  %v218_v7 = vmul.f32 %v210_v0, %v210_v0  ;;  %v215_v9 = vmul.f32 2.0, %v209_v5  ;;  %vm227_vm0 = vcmp.eq.f32.partialorder %v210_v0, inf  ;;  %s256_s23 = scalar_lea.hbm %s768_s3, %s369_s15 }
  0x41   : > { %s365_s14 = sld [smem:[#allocation3 + $0x1]]  ;;  %v230_v10 = vand.u32 2147483648, %v210_v0  ;;  %vm229_vm1 = vcmp.eq.f32.partialorder %v210_v0, 0.0  ;;  %v214_v14 = vmul.f32 %v210_v0, %v209_v5  ;;  %vm217_vm2 = vcmp.le.f32.partialorder %v209_v5, 0.5  ;;  %s208_s8 = scalar_lea.vmem [#allocation9], %s713_s4 }
  0x42   : > { %v219_v12 = vsub.f32 %v210_v0, %v218_v7  ;;  %v367_v15 = vadd.f32 -1.0, %v215_v9  ;;  %s258_s10 = sshll.u32 %s208_s8, 4  ;;  %s260_s12 = sshll.u32 %s256_s23, 4  ;;  %s259_s10 = int_to_ptr.vmem [resolvable:$true] %s258_s10  ;;  %s261_s12 = int_to_ptr.hbm [resolvable:$true] %s260_s12 }
  0x43   : > { %s246_s0 = scalar_lea.sflag [#allocation6], %s710_s29  ;;  %s512_s25 = sshra.s32 %s261_s12, 4  ;;  %s513_s25 = int_to_ptr.hbm [resolvable:$true] %s512_s25 }
  0x44   : > { %s514_s30 = scalar_lea.hbm %s513_s25, 8  ;;  %s518_s11 = scalar_lea.hbm %s768_s3, 16 }
  0x45   : > { %v235_v20 = vstv %s727_s9  ;;  %p515_p6 = scmp.ne.s32.totalorder %s513_s25, %s514_s30  ;;  %p519_p10 = scmp.lt.s32.totalorder %s513_s25, %s768_s3 }
  0x46   : > { %v425_v1 = vpop.eup %424  ;;  %s240_s26 = sadd.f32 %s366_s13, %s727_s9  ;;  %p520_p2 = scmp.lt.s32.totalorder %s518_s11, %s514_s30 }
  0x47   : > { %v221_v2 = vmul.f32 %v425_v1, %v210_v0  ;;  %v237_v18 = vstv %s365_s14  ;;  %p516_p13 = pnand %p515_p6, %p646_p11 }
  0x48   : > { %v241_v21 = vstv %s240_s26  ;;  %v238_v23 = vmul.f32 %v237_v18, %v214_v14  ;;  %p521_p9 = por %p520_p2, %p519_p10 }
  0x49   : > { %v222_v3 = vmul.f32 %v425_v1, %v221_v2  ;;  %v242_v25 = vmul.f32 %v241_v21, %v210_v0  ;;  %p517_p3 = pneg %p516_p13 }
  0x4b   : > { %v223_v4 = vmul.f32 0.5, %v222_v3  ;;  %p522_p0 = pnand %p521_p9, %p517_p3 }
  0x4d   : > { %v224_v6 = vsub.f32 1.5, %v223_v4 }
  0x4f   : > { %v225_v8 = vmul.f32 %v425_v1, %v224_v6 }
  0x51   : > { %v226_v11 = vmul.f32 %v225_v8, %v210_v0 }
  0x53   : > { %v228_v13 = vsel %vm227_vm0, %v210_v0, %v226_v11 }
  0x54   : > { %v231_v16 = vsel %vm229_vm1, %v230_v10, %v228_v13 }
  0x55   : > { %v232_v17 = vsub.f32 %v231_v16, %v210_v0 }
  0x57   : > { %v233_v19 = vsel %vm217_vm2, %v219_v12, %v232_v17 }
  0x58   : > { %v234_v22 = vmul.f32 %v367_v15, %v233_v19 }
  0x5a   : > { %v236_v24 = vmul.f32 %v235_v20, %v234_v22 }
  0x5c   : > { %v239_v26 = vadd.f32 %v238_v23, %v236_v24 }
  0x5e   : > { %v243_v27 = vadd.f32 %v242_v25, %v239_v26 }
  0x60   : > { %244 = vst [vmem:[%s208_s8] sm:$0xff] %v243_v27 }
  0x61   : > { %525 = shalt.err (!%p522_p0)
}
  0x62   : > { %376 = dma.vmem_to_hbm [thread:$0]  (%p646_p11), %s259_s10, 128, %s261_s12, %s246_s0  }
  0x63 PF: > { %s272_s29 = sand.u32 1, %s558_s16   ;;  %p775_p1 = scmp.ge.s32.totalorder %s570_s19, 2 }
  0x64   : > { %s273_s9 = scalar_lea.sflag [#allocation6], %s272_s29 }
  0x65   : > { %p386_p4 = pnand %p775_p1, %p650_p12 }
  0x67   : > { %p387_p7 = pneg %p386_p4 }
  0x69   : > { %553 = dma.done.wait (%p387_p7), %s273_s9, 128  }
  0x6a   : > { %555 = vsyncadd (%p387_p7), %s273_s9, 4294967168  ;;  %p27_p5 = scmp.ge.s32.totalorder %s621_s21, 4   ;;  %s776_s16 = smov %s562_s17 }
  0x6b   : > { %s777_s17 = smov %s566_s18  ;;  %s778_s18 = smov %s633_s24 }
  0x6c   : > { %s779_s19 = smov %s621_s21  ;;  %29 = sbr.rel (!%p27_p5) target bundleno = 13 (0xd), region = 86 }
  0x71   :  { %279 = vsyncpa [#allocation5], 1 }
  0x72   :  { %281 = vsyncpa [#allocation5 + $0x1], 1 }
  0x73   :  { %282 = vsyncpa [#allocation8], 1 }
  0x74   :  { %284 = vsyncpa [#allocation8 + $0x1], 1 }
  0x75   :  { %285 = vsyncpa [#allocation6], 1 }
  0x76   :  { %287 = vsyncpa [#allocation6 + $0x1], 1 }

</bundles_post_ra>
